<compile_context>
chip_gen: v7x
topology: tpu7x:2x2x1
jax: 0.10.0
libtpu: 0.0.40
codegen_flags: <defaults>
</compile_context>

<pallas_src>
import functools

import jax
import jax.numpy as jnp
from jax.experimental import pallas as pl
from jax.experimental.pallas import tpu as pltpu


def masknet2_kernel(x_ref, w1_ref, b1_ref, w2_ref, b2_ref, o_ref, *, bf16_epilogue):
    # x_ref : (TB, D) f32 tile of x (pipelined)
    # w1_ref: (D, H)  bf16 resident weight
    # b1_ref: (1, H)  f32
    # w2_ref: (H, D)  bf16 resident weight
    # b2_ref: (1, D)  f32
    # o_ref : (TB, D) f32 tile of y
    x_bf = x_ref[...].astype(jnp.bfloat16)
    # (TB, D) @ (D, H) -> (TB, H); bf16 operands, f32 MXU accumulation.
    h = jnp.dot(x_bf, w1_ref[...], preferred_element_type=jnp.float32)
    h = h + b1_ref[...]
    if bf16_epilogue:
        # v6e/v7x: bf16 EUP tanh packs 2 elems/lane and feeds the MXU directly.
        h = jnp.tanh(h.astype(jnp.bfloat16))
    else:
        # v5e and older: no bf16 VPU/EUP path -> keep the f32 epilogue.
        h = jnp.tanh(h).astype(jnp.bfloat16)
    # (TB, H) @ (H, D) -> (TB, D)
    y = jnp.dot(h, w2_ref[...], preferred_element_type=jnp.float32)
    o_ref[...] = (y + b2_ref[...]).astype(o_ref.dtype)


def _use_bf16_epilogue():
    """bf16 bias+tanh epilogue only on chips with a bf16 VPU/EUP path (v6e+)."""
    try:
        kind = jax.devices()[0].device_kind.lower()
    except Exception:
        return False
    return not any(old in kind for old in ("v2", "v3", "v4", "v5"))


def _default_tile_b(batch):
    # Batch tile rows (second-minor axis, must be a multiple of 8).  Cap at
    # 4096 so each grid step moves enough HBM bytes to hide the fixed per-step
    # pipeline overhead; shrink for small batches to avoid mostly-padding work.
    tb = 4096
    while tb > 128 and batch <= tb // 2:
        tb //= 2
    return tb


def masknet2_forward(x, w1, b1, w2, b2, *, tile_b=None, bf16_epilogue=None):
    """MaskNet2 forward.

    x : (B, D) float32
    w1: (D, H), b1: (H,) or (1, H)     (transposed vs. torch Linear weight)
    w2: (H, D), b2: (D,) or (1, D)
    returns (B, D) float32.
    """
    B, D = x.shape
    H = w1.shape[1]

    if bf16_epilogue is None:
        bf16_epilogue = _use_bf16_epilogue()
    if tile_b is None:
        tile_b = _default_tile_b(B)
    if tile_b % 8 != 0:
        raise ValueError(f"tile_b must be a multiple of 8 (sublane axis), got {tile_b}")

    grid = (pl.cdiv(B, tile_b),)

    # Weights pre-cast once for the MXU; biases reshaped for row-broadcast.
    w1b = w1.astype(jnp.bfloat16)                         # (D, H)
    w2b = w2.astype(jnp.bfloat16)                         # (H, D)
    b1r = jnp.reshape(b1, (1, H)).astype(jnp.float32)
    b2r = jnp.reshape(b2, (1, D)).astype(jnp.float32)

    cost = pl.CostEstimate(
        flops=4 * B * D * H,                              # two matmuls
        transcendentals=B * H,                            # tanh
        bytes_accessed=(2 * B * D * 4                     # x in + y out (f32)
                        + 2 * D * H * 2                   # bf16 weights
                        + (D + H) * 4),                   # biases
    )

    # Per-step VMEM footprint: the (TB, 16) f32 in/out tiles are lane-padded to
    # 128 lanes (512 B/row each, double-buffered) plus the (TB, H) f32/bf16
    # hidden activations -> ~4 KiB per batch row.  Add headroom, cap well under
    # v7x's 64 MiB physical VMEM.
    vmem_limit = min(48 * 1024 * 1024, tile_b * 4 * 1024 + 8 * 1024 * 1024)

    kernel = functools.partial(masknet2_kernel, bf16_epilogue=bf16_epilogue)

    return pl.pallas_call(
        kernel,
        out_shape=jax.ShapeDtypeStruct((B, D), x.dtype),
        grid_spec=pltpu.PrefetchScalarGridSpec(
            num_scalar_prefetch=0,
            grid=grid,
            in_specs=[
                pl.BlockSpec((tile_b, D), lambda i: (i, 0)),   # x tile (pipelined)
                # Resident operands: constant index_map -> fetched once.
                pl.BlockSpec((D, H), lambda i: (0, 0)),        # W1
                pl.BlockSpec((1, H), lambda i: (0, 0)),        # b1
                pl.BlockSpec((H, D), lambda i: (0, 0)),        # W2
                pl.BlockSpec((1, D), lambda i: (0, 0)),        # b2
            ],
            out_specs=pl.BlockSpec((tile_b, D), lambda i: (i, 0)),
        ),
        compiler_params=pltpu.CompilerParams(
            dimension_semantics=("parallel",),
            vmem_limit_bytes=vmem_limit,
        ),
        cost_estimate=cost,
    )(x, w1b, b1r, w2b, b2r)


def masknet2_apply(x, w1, b1, w2, b2, *, min_pallas_batch=128, tile_b=None):
    """Dispatcher: tiny batches go to a plain-XLA path with matching bf16 numerics."""
    if x.shape[0] < min_pallas_batch:
        h = jnp.dot(x.astype(jnp.bfloat16), w1.astype(jnp.bfloat16),
                    preferred_element_type=jnp.float32)
        h = jnp.tanh(h + jnp.reshape(b1, (1, -1))).astype(jnp.bfloat16)
        y = jnp.dot(h, w2.astype(jnp.bfloat16), preferred_element_type=jnp.float32)
        return y + jnp.reshape(b2, (1, -1))
    return masknet2_forward(x, w1, b1, w2, b2, tile_b=tile_b)


def init_params(key, input_dim, hidden_dim):
    """Deterministic init mimicking nn.Linear's uniform(-1/sqrt(fan_in), 1/sqrt(fan_in))."""
    k1, k2, k3, k4 = jax.random.split(key, 4)
    lim1 = 1.0 / jnp.sqrt(jnp.float32(input_dim))
    lim2 = 1.0 / jnp.sqrt(jnp.float32(hidden_dim))
    # stored transposed vs torch: (in, out)
    w1 = jax.random.uniform(k1, (input_dim, hidden_dim), jnp.float32, -lim1, lim1)
    b1 = jax.random.uniform(k2, (1, hidden_dim), jnp.float32, -lim1, lim1)
    w2 = jax.random.uniform(k3, (hidden_dim, input_dim), jnp.float32, -lim2, lim2)
    b2 = jax.random.uniform(k4, (1, input_dim), jnp.float32, -lim2, lim2)
    return w1, b1, w2, b2


if __name__ == "__main__":
    key = jax.random.PRNGKey(0)
    kx1, kx2, kp = jax.random.split(key, 3)

    input_dim = 16
    hidden_dim = 128
    w1, b1, w2, b2 = init_params(kp, input_dim, hidden_dim)

    bf16_ep = _use_bf16_epilogue()

    def reference_f32(x):
        return jnp.tanh(x @ w1 + b1) @ w2 + b2

    def reference_emulated(x):
        # Mirrors the kernel's bf16 MXU operands / f32 accumulation / epilogue dtype.
        h = jnp.dot(x.astype(jnp.bfloat16), w1.astype(jnp.bfloat16),
                    preferred_element_type=jnp.float32) + b1
        h = jnp.tanh(h.astype(jnp.bfloat16)) if bf16_ep else jnp.tanh(h).astype(jnp.bfloat16)
        return jnp.dot(h, w2.astype(jnp.bfloat16),
                       preferred_element_type=jnp.float32) + b2

    # Case 1: tiny batch (single ragged block -> exercises OOB-row masking).
    x_small = jax.random.normal(kx1, (8, input_dim), jnp.float32)
    out_small = jax.block_until_ready(masknet2_forward(x_small, w1, b1, w2, b2))
    assert out_small.shape == (8, input_dim)
    assert jnp.allclose(out_small, reference_emulated(x_small), atol=5e-3, rtol=5e-3)
    assert jnp.allclose(out_small, reference_f32(x_small), atol=5e-2, rtol=5e-2)

    # Case 2: ragged multi-step grid (300 rows, tile 128 -> 3 grid steps, last partial).
    x_big = jax.random.normal(kx2, (300, input_dim), jnp.float32)
    out_big = jax.block_until_ready(
        masknet2_forward(x_big, w1, b1, w2, b2, tile_b=128))
    assert out_big.shape == (300, input_dim)
    assert jnp.allclose(out_big, reference_emulated(x_big), atol=5e-3, rtol=5e-3)
    assert jnp.allclose(out_big, reference_f32(x_big), atol=5e-2, rtol=5e-2)

    print("KERNEL_OK")
</pallas_src>

<mosaic_0001>
module attributes {stable_mosaic.version = 11 : i64} {
  func.func @masknet2_kernel(%arg0: i32, %arg1: memref<128x16xf32, #tpu.memory_space<vmem>>, %arg2: memref<16x128xbf16, #tpu.memory_space<vmem>>, %arg3: memref<1x128xf32, #tpu.memory_space<vmem>>, %arg4: memref<128x16xbf16, #tpu.memory_space<vmem>>, %arg5: memref<1x16xf32, #tpu.memory_space<vmem>>, %arg6: memref<128x16xf32, #tpu.memory_space<vmem>>) attributes {dimension_semantics = [#tpu.dimension_semantics<parallel>], iteration_bounds = array<i64: 1>, scalar_prefetch = 0 : i64, scratch_operands = 0 : i64, tpu.core_type = #tpu.core_type<tc>, window_params = [{transform_indices = @transform_0, window_bounds = array<i64: 128, 16>}, {pipeline_mode = #tpu.pipeline_mode<synchronous>, transform_indices = @transform_1, window_bounds = array<i64: 16, 128>}, {pipeline_mode = #tpu.pipeline_mode<synchronous>, transform_indices = @transform_2, window_bounds = array<i64: 1, 128>}, {pipeline_mode = #tpu.pipeline_mode<synchronous>, transform_indices = @transform_3, window_bounds = array<i64: 128, 16>}, {pipeline_mode = #tpu.pipeline_mode<synchronous>, transform_indices = @transform_4, window_bounds = array<i64: 1, 16>}, {transform_indices = @transform_5, window_bounds = array<i64: 128, 16>}]} {
    %c0 = arith.constant 0 : index
    %c0_0 = arith.constant 0 : index
    %0 = vector.load %arg1[%c0, %c0_0] : memref<128x16xf32, #tpu.memory_space<vmem>>, vector<128x16xf32>
    %1 = arith.truncf %0 : vector<128x16xf32> to vector<128x16xbf16>
    %c0_1 = arith.constant 0 : index
    %c0_2 = arith.constant 0 : index
    %2 = vector.load %arg2[%c0_1, %c0_2] : memref<16x128xbf16, #tpu.memory_space<vmem>>, vector<16x128xbf16>
    %cst = arith.constant dense<0.000000e+00> : vector<128x128xf32>
    %3 = tpu.matmul %1, %2, %cst {dimension_numbers = #tpu.dot_dimension_numbers<[1], [0], [0], [1], [0, 0, 1, 1], [], []>} : vector<128x16xbf16>, vector<16x128xbf16>, vector<128x128xf32> -> vector<128x128xf32>
    %c0_3 = arith.constant 0 : index
    %c0_4 = arith.constant 0 : index
    %4 = vector.load %arg3[%c0_3, %c0_4] : memref<1x128xf32, #tpu.memory_space<vmem>>, vector<1x128xf32>
    %5 = vector.broadcast %4 : vector<1x128xf32> to vector<128x128xf32>
    %6 = arith.addf %3, %5 : vector<128x128xf32>
    %7 = arith.truncf %6 : vector<128x128xf32> to vector<128x128xbf16>
    %8 = math.tanh %7 : vector<128x128xbf16>
    %c0_5 = arith.constant 0 : index
    %c0_6 = arith.constant 0 : index
    %9 = vector.load %arg4[%c0_5, %c0_6] : memref<128x16xbf16, #tpu.memory_space<vmem>>, vector<128x16xbf16>
    %cst_7 = arith.constant dense<0.000000e+00> : vector<128x16xf32>
    %10 = tpu.matmul %8, %9, %cst_7 {dimension_numbers = #tpu.dot_dimension_numbers<[1], [0], [0], [1], [0, 0, 1, 1], [], []>} : vector<128x128xbf16>, vector<128x16xbf16>, vector<128x16xf32> -> vector<128x16xf32>
    %c0_8 = arith.constant 0 : index
    %c0_9 = arith.constant 0 : index
    %11 = vector.load %arg5[%c0_8, %c0_9] : memref<1x16xf32, #tpu.memory_space<vmem>>, vector<1x16xf32>
    %12 = vector.broadcast %11 : vector<1x16xf32> to vector<128x16xf32>
    %13 = arith.addf %10, %12 : vector<128x16xf32>
    %c0_10 = arith.constant 0 : index
    %c0_11 = arith.constant 0 : index
    %14 = vector.load %arg6[%c0_10, %c0_11] : memref<128x16xf32, #tpu.memory_space<vmem>>, vector<128x16xf32>
    tpu.vector_store %arg6[%c0_10, %c0_11], %13 {strides = array<i32>} : memref<128x16xf32, #tpu.memory_space<vmem>>, vector<128x16xf32>,
    return
  }
  func.func @transform_0(%arg0: i32) -> (i32, i32) {
    %c0_i32 = arith.constant 0 : i32
    %c0_i32_0 = arith.constant 0 : i32
    return %arg0, %c0_i32 : i32, i32
  }
  func.func @transform_1(%arg0: i32) -> (i32, i32) {
    %c0_i32 = arith.constant 0 : i32
    %c0_i32_0 = arith.constant 0 : i32
    %c0_i32_1 = arith.constant 0 : i32
    return %c0_i32, %c0_i32_0 : i32, i32
  }
  func.func @transform_2(%arg0: i32) -> (i32, i32) {
    %c0_i32 = arith.constant 0 : i32
    %c0_i32_0 = arith.constant 0 : i32
    %c0_i32_1 = arith.constant 0 : i32
    return %c0_i32, %c0_i32_0 : i32, i32
  }
  func.func @transform_3(%arg0: i32) -> (i32, i32) {
    %c0_i32 = arith.constant 0 : i32
    %c0_i32_0 = arith.constant 0 : i32
    %c0_i32_1 = arith.constant 0 : i32
    return %c0_i32, %c0_i32_0 : i32, i32
  }
  func.func @transform_4(%arg0: i32) -> (i32, i32) {
    %c0_i32 = arith.constant 0 : i32
    %c0_i32_0 = arith.constant 0 : i32
    %c0_i32_1 = arith.constant 0 : i32
    return %c0_i32, %c0_i32_0 : i32, i32
  }
  func.func @transform_5(%arg0: i32) -> (i32, i32) {
    %c0_i32 = arith.constant 0 : i32
    %c0_i32_0 = arith.constant 0 : i32
    return %arg0, %c0_i32 : i32, i32
  }
}

</mosaic_0001>

<bundles_post_ra>
// kernel: tpu_custom_call.1
= control target key start
LH: loop header
LB: loop body
LE: loop exit
PB: predicated region body
PF: predicated region fallthrough
CT: control target
= control target key end

     0   :  { %10 = vsyncpa [#allocation3], 0  ;;  %vm61_vm0 = vcmask 130048   ;;  %s711_s0 = inlined_call_operand.vmem [shape: f32[8,16], index: 0, kind: input, shape index: {}]   ;;  %s712_s1 = inlined_call_operand.vmem [shape: bf16[16,128], index: 1, kind: input, shape index: {}]   ;;  %s713_s2 = inlined_call_operand.vmem [shape: f32[1,128], index: 2, kind: input, shape index: {}]   ;;  %s714_s3 = inlined_call_operand.vmem [shape: bf16[128,16], index: 3, kind: input, shape index: {}]   ;;  %s715_s4 = inlined_call_operand.vmem [shape: f32[1,16], index: 4, kind: input, shape index: {}]   ;;  %s716_s5 = inlined_call_operand.hbm [shape: f32[8,16], index: 5, kind: output, shape index: {}]  }
   0x1   :  { %v512_v0 = vld [vmem:[%s712_s1] sm:$0xff]   ;;  %v23_v2 = vld [vmem:[%s711_s0 + $0x8] sm:$0xff]  ;;  %v24_v4 = vld [vmem:[%s711_s0 + $0x10] sm:$0xff] }
   0x2   :  { %v22_v1 = vld [vmem:[%s711_s0] sm:$0xff]  ;;  %v25_v5 = vld [vmem:[%s711_s0 + $0x18] sm:$0xff]  ;;  %443 = vmatprep.subr.bf16.mxu0 %v512_v0  ;;  %v27_v8 = vld [vmem:[%s711_s0 + $0x28] sm:$0xff] }
   0x3   :  { %v38_v3 = vpack.c.bf16 %v23_v2, %v22_v1  ;;  %v26_v6 = vld [vmem:[%s711_s0 + $0x20] sm:$0xff]  ;;  %v39_v7 = vpack.c.bf16 %v25_v5, %v24_v4  ;;  %444 = vmatpush3.bf16.msra.mxu0 %v512_v0  ;;  %v28_v10 = vld [vmem:[%s711_s0 + $0x30] sm:$0xff]  ;;  %v29_v11 = vld [vmem:[%s711_s0 + $0x38] sm:$0xff] }
   0x4   :  { %v40_v9 = vpack.c.bf16 %v27_v8, %v26_v6  ;;  %v30_v12 = vld [vmem:[%s711_s0 + $0x40] sm:$0xff]  ;;  %v31_v13 = vld [vmem:[%s711_s0 + $0x48] sm:$0xff]  ;;  %v515_v16 = vld [vmem:[%s714_s3 + $0x10] sm:$0xff]   ;;  %v41_v17 = vpack.c.bf16 %v29_v11, %v28_v10 }
   0x5   :  { %445 = vmatprep.mubr.msk.bf16.mxu0 %vm61_vm0, %v38_v3  ;;  %v513_v14 = vld [vmem:[%s714_s3] sm:$0xff]   ;;  %v514_v15 = vld [vmem:[%s714_s3 + $0x8] sm:$0xff]   ;;  %v42_v18 = vpack.c.bf16 %v31_v13, %v30_v12  ;;  %v32_v19 = vld [vmem:[%s711_s0 + $0x50] sm:$0xff] }
   0x6   :  { %446 = vmatmul.mubr.msk.bf16.vlgmr.msra.gmra.mrb[0].mxu0 %vm61_vm0, %v39_v7  ;;  %461 = vmatprep.subr.bf16.mxu0 %v513_v14  ;;  %v33_v20 = vld [vmem:[%s711_s0 + $0x58] sm:$0xff]  ;;  %v34_v21 = vld [vmem:[%s711_s0 + $0x60] sm:$0xff]  ;;  %v35_v22 = vld [vmem:[%s711_s0 + $0x68] sm:$0xff] }
   0x7   :  { %449 = vmatprep.mubr.msk.bf16.mxu0 %vm61_vm0, %v40_v9  ;;  %493 = vmatprep.subr.bf16.mxu1 %v513_v14  ;;  %v43_v23 = vpack.c.bf16 %v33_v20, %v32_v19  ;;  %v44_v24 = vpack.c.bf16 %v35_v22, %v34_v21  ;;  %v36_v25 = vld [vmem:[%s711_s0 + $0x70] sm:$0xff]  ;;  %v37_v26 = vld [vmem:[%s711_s0 + $0x78] sm:$0xff]  ;;  %v517_v29 = vld [vmem:[%s714_s3 + $0x20] sm:$0xff]  }
   0x8   :  { %462 = vmatpush3.bf16.msra.mxu0 %v513_v14  ;;  %501 = vmatpush3.bf16.msra.mxu1 %v513_v14  ;;  %v45_v27 = vpack.c.bf16 %v37_v26, %v36_v25  ;;  %v516_v28 = vld [vmem:[%s714_s3 + $0x18] sm:$0xff]   ;;  %v518_v30 = vld [vmem:[%s714_s3 + $0x28] sm:$0xff]   ;;  %v519_v31 = vld [vmem:[%s714_s3 + $0x30] sm:$0xff]  }
   0x9   :  { %463 = vmatprep.subr.bf16.mxu0 %v514_v15  ;;  %494 = vmatprep.subr.bf16.mxu1 %v514_v15  ;;  %v520_v32 = vld [vmem:[%s714_s3 + $0x38] sm:$0xff]   ;;  %v399_v34 = vld [vmem:[%s713_s2] ss:$0 sm:$0xff] }
   0xc   :  { %464 = vmatpush3.bf16.msra.mxu0 %v514_v15  ;;  %502 = vmatpush3.bf16.msra.mxu1 %v514_v15 }
   0xd   :  { %465 = vmatprep.subr.bf16.mxu0 %v515_v16  ;;  %495 = vmatprep.subr.bf16.mxu1 %v515_v16 }
   0xe   :  { %450 = vmatmul.mubr.msk.bf16.gmra.mrb[4].mxu0 %vm61_vm0, %v41_v17 }
   0xf   :  { %453 = vmatprep.mubr.msk.bf16.mxu0 %vm61_vm0, %v42_v18  ;;  %v409_v18 = vld [vmem:[%s715_s4] ss:$0 sm:$0xff] }
  0x10   :  { %466 = vmatpush3.bf16.msra.mxu0 %v515_v16  ;;  %503 = vmatpush3.bf16.msra.mxu1 %v515_v16 }
  0x11   :  { %467 = vmatprep.subr.bf16.mxu0 %v516_v28  ;;  %496 = vmatprep.subr.bf16.mxu1 %v516_v28 }
  0x14   :  { %468 = vmatpush3.bf16.msra.mxu0 %v516_v28  ;;  %504 = vmatpush3.bf16.msra.mxu1 %v516_v28 }
  0x15   :  { %469 = vmatprep.subr.bf16.mxu0 %v517_v29  ;;  %497 = vmatprep.subr.bf16.mxu1 %v517_v29 }
  0x16   :  { %454 = vmatmul.mubr.msk.bf16.gmra.mrb[8].mxu0 %vm61_vm0, %v43_v23 }
  0x17   :  { %457 = vmatprep.mubr.msk.bf16.mxu0 %vm61_vm0, %v44_v24 }
  0x18   :  { %470 = vmatpush3.bf16.msra.mxu0 %v517_v29  ;;  %505 = vmatpush3.bf16.msra.mxu1 %v517_v29 }
  0x19   :  { %471 = vmatprep.subr.bf16.mxu0 %v518_v30  ;;  %498 = vmatprep.subr.bf16.mxu1 %v518_v30 }
  0x1c   :  { %472 = vmatpush3.bf16.msra.mxu0 %v518_v30  ;;  %506 = vmatpush3.bf16.msra.mxu1 %v518_v30 }
  0x1d   :  { %473 = vmatprep.subr.bf16.mxu0 %v519_v31  ;;  %499 = vmatprep.subr.bf16.mxu1 %v519_v31 }
  0x1e   :  { %458 = vmatmul.mubr.msk.bf16.gmra.mrb[12].mxu0 %vm61_vm0, %v45_v27 }
  0x20   :  { %474 = vmatpush3.bf16.msra.mxu0 %v519_v31  ;;  %507 = vmatpush3.bf16.msra.mxu1 %v519_v31 }
  0x21   :  { %475 = vmatprep.subr.bf16.mxu0 %v520_v32  ;;  %500 = vmatprep.subr.bf16.mxu1 %v520_v32 }
  0x24   :  { %476 = vmatpush3.bf16.msra.mxu0 %v520_v32  ;;  %508 = vmatpush3.bf16.msra.mxu1 %v520_v32 }
  0xd9   :  { %v447_v33 = vpop.f32.mrb[0].mxu0 }
  0xda   :  { %v120_v35 = vpop.f32.mrb[1].mxu0  ;;  %v129_v37 = vadd.f32 %v447_v33, %v399_v34 }
  0xdb   :  { %v448_v36 = vpop.f32.mrb[2].mxu0  ;;  %v121_v40 = vadd.f32 %v399_v34, %v120_v35 }
  0xdc   :  { %v132_v38 = vadd.f32 %v448_v36, %v399_v34  ;;  %v123_v39 = vpop.f32.mrb[3].mxu0 }
  0xdd   :  { %v124_v41 = vadd.f32 %v399_v34, %v123_v39 }
  0xde   :  { %v184_v42 = vpack.c.bf16 %v132_v38, %v129_v37 }
  0xdf   :  { %v183_v43 = vpack.c.bf16 %v124_v41, %v121_v40 }
  0xe1   :  { %521 = vtanh.bf16 %v183_v43  ;;  %v451_v44 = vpop.f32.mrb[4].mxu0 }
  0xe2   :  { %523 = vtanh.bf16 %v184_v42  ;;  %v136_v45 = vpop.f32.mrb[5].mxu0  ;;  %v145_v47 = vadd.f32 %v451_v44, %v399_v34 }
  0xe3   :  { %v452_v46 = vpop.f32.mrb[6].mxu0  ;;  %v137_v50 = vadd.f32 %v399_v34, %v136_v45 }
  0xe4   :  { %v148_v48 = vadd.f32 %v452_v46, %v399_v34  ;;  %v139_v49 = vpop.f32.mrb[7].mxu0 }
  0xe5   :  { %v140_v51 = vadd.f32 %v399_v34, %v139_v49 }
  0xe6   :  { %v186_v52 = vpack.c.bf16 %v148_v48, %v145_v47 }
  0xe7   :  { %v185_v53 = vpack.c.bf16 %v140_v51, %v137_v50 }
  0xe9   :  { %v455_v54 = vpop.f32.mrb[8].mxu0  ;;  %525 = vtanh.bf16 %v185_v53 }
  0xea   :  { %527 = vtanh.bf16 %v186_v52  ;;  %v152_v55 = vpop.f32.mrb[9].mxu0  ;;  %v161_v58 = vadd.f32 %v455_v54, %v399_v34 }
  0xeb   :  { %v456_v56 = vpop.f32.mrb[10].mxu0  ;;  %v153_v62 = vadd.f32 %v399_v34, %v152_v55 }
  0xec   :  { %v522_v57 = vpop.eup %521  ;;  %v164_v59 = vadd.f32 %v456_v56, %v399_v34  ;;  %v155_v60 = vpop.f32.mrb[11].mxu0 }
  0xed   :  { %v524_v61 = vpop.eup %523  ;;  %v156_v63 = vadd.f32 %v399_v34, %v155_v60  ;;  %477 = vmatprep.mubr.bf16.mxu0 %v522_v57 }
  0xee   :  { %v188_v0 = vpack.c.bf16 %v164_v59, %v161_v58  ;;  %478 = vmatmul.mubr.bf16.vlgmr.msra.gmra.mrb[16].mxu0 %v524_v61 }
  0xef   :  { %v187_v1 = vpack.c.bf16 %v156_v63, %v153_v62 }
  0xf1   :  { %529 = vtanh.bf16 %v187_v1  ;;  %v459_v2 = vpop.f32.mrb[12].mxu0 }
  0xf2   :  { %531 = vtanh.bf16 %v188_v0  ;;  %v168_v3 = vpop.f32.mrb[13].mxu0  ;;  %v177_v6 = vadd.f32 %v459_v2, %v399_v34 }
  0xf3   :  { %v460_v4 = vpop.f32.mrb[14].mxu0  ;;  %v169_v10 = vadd.f32 %v399_v34, %v168_v3 }
  0xf4   :  { %v526_v5 = vpop.eup %525  ;;  %v180_v7 = vadd.f32 %v460_v4, %v399_v34  ;;  %v171_v8 = vpop.f32.mrb[15].mxu0 }
  0xf5   :  { %v528_v9 = vpop.eup %527  ;;  %v172_v11 = vadd.f32 %v399_v34, %v171_v8  ;;  %481 = vmatprep.mubr.bf16.mxu1 %v526_v5 }
  0xf6   :  { %v190_v12 = vpack.c.bf16 %v180_v7, %v177_v6  ;;  %482 = vmatmul.mubr.bf16.vlgmr.msra.gmra.mrb[0].mxu1 %v528_v9 }
  0xf7   :  { %v189_v13 = vpack.c.bf16 %v172_v11, %v169_v10 }
  0xf9   :  { %533 = vtanh.bf16 %v189_v13 }
  0xfa   :  { %535 = vtanh.bf16 %v190_v12 }
  0xfc   :  { %v530_v14 = vpop.eup %529 }
  0xfd   :  { %v532_v15 = vpop.eup %531  ;;  %485 = vmatprep.mubr.bf16.mxu1 %v530_v14 }
  0xfe   :  { %486 = vmatmul.mubr.bf16.gmra.mrb[4].mxu1 %v532_v15 }
 0x104   :  { %v534_v16 = vpop.eup %533 }
 0x105   :  { %v536_v17 = vpop.eup %535  ;;  %489 = vmatprep.mubr.bf16.mxu1 %v534_v16 }
 0x106   :  { %490 = vmatmul.mubr.bf16.gmra.mrb[8].mxu1 %v536_v17 }
 0x1c1   :  { %v479_v19 = vpop.f32.mrb[16].mxu0 }
 0x1c2   :  { %v313_v20 = vadd.f32 %v479_v19, %v409_v18  ;;  %v304_v21 = vpop.f32.mrb[17].mxu0 }
 0x1c3   :  { %v305_v22 = vadd.f32 %v409_v18, %v304_v21  ;;  %v480_v23 = vpop.f32.mrb[18].mxu0 }
 0x1c4   :  { %369 = vst.msk [vmem:[#allocation2 + $0x10] sm:$0xff] %vm61_vm0, %v313_v20  ;;  %v316_v24 = vadd.f32 %v480_v23, %v409_v18  ;;  %v307_v25 = vpop.f32.mrb[19].mxu0 }
 0x1c5   :  { %367 = vst.msk [vmem:[#allocation2] sm:$0xff] %vm61_vm0, %v305_v22  ;;  %v308_v26 = vadd.f32 %v409_v18, %v307_v25 }
 0x1c6   :  { %370 = vst.msk [vmem:[#allocation2 + $0x18] sm:$0xff] %vm61_vm0, %v316_v24 }
 0x1c7   :  { %368 = vst.msk [vmem:[#allocation2 + $0x8] sm:$0xff] %vm61_vm0, %v308_v26 }
 0x1c9   :  { %v483_v27 = vpop.f32.mrb[0].mxu1 }
 0x1ca   :  { %v329_v28 = vadd.f32 %v483_v27, %v409_v18  ;;  %v320_v29 = vpop.f32.mrb[1].mxu1 }
 0x1cb   :  { %v321_v30 = vadd.f32 %v409_v18, %v320_v29  ;;  %v484_v31 = vpop.f32.mrb[2].mxu1 }
 0x1cc   :  { %373 = vst.msk [vmem:[#allocation2 + $0x30] sm:$0xff] %vm61_vm0, %v329_v28  ;;  %v332_v32 = vadd.f32 %v484_v31, %v409_v18  ;;  %v323_v33 = vpop.f32.mrb[3].mxu1 }
 0x1cd   :  { %371 = vst.msk [vmem:[#allocation2 + $0x20] sm:$0xff] %vm61_vm0, %v321_v30  ;;  %v324_v34 = vadd.f32 %v409_v18, %v323_v33 }
 0x1ce   :  { %374 = vst.msk [vmem:[#allocation2 + $0x38] sm:$0xff] %vm61_vm0, %v332_v32 }
 0x1cf   :  { %372 = vst.msk [vmem:[#allocation2 + $0x28] sm:$0xff] %vm61_vm0, %v324_v34 }
 0x1d1   :  { %v487_v35 = vpop.f32.mrb[4].mxu1 }
 0x1d2   :  { %v345_v36 = vadd.f32 %v487_v35, %v409_v18  ;;  %v336_v37 = vpop.f32.mrb[5].mxu1 }
 0x1d3   :  { %v337_v38 = vadd.f32 %v409_v18, %v336_v37  ;;  %v488_v39 = vpop.f32.mrb[6].mxu1 }
 0x1d4   :  { %377 = vst.msk [vmem:[#allocation2 + $0x50] sm:$0xff] %vm61_vm0, %v345_v36  ;;  %v348_v40 = vadd.f32 %v488_v39, %v409_v18  ;;  %v339_v41 = vpop.f32.mrb[7].mxu1 }
 0x1d5   :  { %375 = vst.msk [vmem:[#allocation2 + $0x40] sm:$0xff] %vm61_vm0, %v337_v38  ;;  %v340_v42 = vadd.f32 %v409_v18, %v339_v41 }
 0x1d6   :  { %378 = vst.msk [vmem:[#allocation2 + $0x58] sm:$0xff] %vm61_vm0, %v348_v40 }
 0x1d7   :  { %376 = vst.msk [vmem:[#allocation2 + $0x48] sm:$0xff] %vm61_vm0, %v340_v42 }
 0x1d9   :  { %v491_v43 = vpop.f32.mrb[8].mxu1 }
 0x1da   :  { %v361_v44 = vadd.f32 %v491_v43, %v409_v18  ;;  %v352_v45 = vpop.f32.mrb[9].mxu1 }
 0x1db   :  { %v353_v46 = vadd.f32 %v409_v18, %v352_v45  ;;  %v492_v47 = vpop.f32.mrb[10].mxu1 }
 0x1dc   :  { %381 = vst.msk [vmem:[#allocation2 + $0x70] sm:$0xff] %vm61_vm0, %v361_v44  ;;  %v364_v48 = vadd.f32 %v492_v47, %v409_v18  ;;  %v355_v49 = vpop.f32.mrb[11].mxu1 }
 0x1dd   :  { %379 = vst.msk [vmem:[#allocation2 + $0x60] sm:$0xff] %vm61_vm0, %v353_v46  ;;  %v356_v50 = vadd.f32 %v409_v18, %v355_v49 }
 0x1de   :  { %382 = vst.msk [vmem:[#allocation2 + $0x78] sm:$0xff] %vm61_vm0, %v364_v48 }
 0x1df   :  { %380 = vst.msk [vmem:[#allocation2 + $0x68] sm:$0xff] %vm61_vm0, %v356_v50 }
 0x1e0   :  { %387 = vsyncadd [#allocation3], 1920  ;;  %s561_s4 = smov [#allocation2]  }
 0x1e1   :  { %s388_s17 = sshll.u32 %s561_s4, 4  ;;  %s389_s17 = int_to_ptr.vmem [resolvable:$true] %s388_s17 }
 0x1e2   :  { %s537_s18 = scalar_lea.vmem %s389_s17, 128  ;;  %s541_s19 = scalar_lea.vmem %s389_s17, 2048 }
 0x1e3   :  { %p538_p0 = scmp.ne.s32.totalorder %s389_s17, %s537_s18  ;;  %p542_p1 = scmp.lt.s32.totalorder %s389_s17, %s389_s17 }
 0x1e4   :  { %p543_p2 = scmp.lt.s32.totalorder %s541_s19, %s537_s18 }
 0x1e6   :  { %p544_p3 = por %p543_p2, %p542_p1 }
 0x1e8   :  { %p545_p4 = pnand %p544_p3, %p538_p0 }
 0x1ea   :  { %548 = shalt.err (!%p545_p4)
}
 0x1eb   :  { %s549_s22 = scalar_lea.hbm %s716_s5, 128 }
 0x1ec   :  { %p550_p5 = scmp.ne.s32.totalorder %s716_s5, %s549_s22  ;;  %p553_p6 = scmp.lt.u32.totalorder %s549_s22, %s716_s5 }
 0x1ee   :  { %p555_p7 = pnand %p553_p6, %p550_p5 }
 0x1f0   :  { %558 = shalt.err (!%p555_p7)
}
 0x1f1   :  { %s562_s27 = smov 128   ;;  %s563_s28 = smov 8  }
 0x1f2   :  { %394 = dma.vmem_to_hbm [thread:$0]  %s389_s17, 128, %s716_s5, [#allocation3], %s562_s27, %s562_s27, %s563_s28  }
 0x1f3   :  { %559 = dma.done.wait [#allocation3], 2048  }
 0x1f4   :  { %560 = vsyncadd [#allocation3], 4294965248 }
 0x1f5   :  { %398 = vsyncpa [#allocation3], 1 }

</bundles_post_ra>
